<compile_context>
chip_gen: v7x
topology: tpu7x:2x2x1
jax: 0.10.0
libtpu: 0.0.40
codegen_flags: <defaults>
</compile_context>

<pallas_src>
import functools

import jax
import jax.numpy as jnp
from jax.experimental import pallas as pl
from jax.experimental.pallas import tpu as pltpu


def build_pe_table(d_model: int = 128, max_seq_length: int = 30) -> jnp.ndarray:
    """Reproduce the PyTorch buffer `pe`, shape (max_seq_length, 1, d_model)."""
    position = jnp.arange(max_seq_length, dtype=jnp.float32)[:, None]      # (S, 1)
    even_idx = jnp.arange(0, d_model, 2, dtype=jnp.float32)                # (D/2,)
    odd_idx = jnp.arange(1, d_model, 2, dtype=jnp.float32)                 # (D/2,)
    # Matches the module exactly (NOT the standard Vaswani formula):
    #   div_term_even = 10 ** (4*2*even_idx / d_model)
    #   div_term_odd  = 10 ** (4*2*odd_idx  / d_model)
    div_term_even = jnp.power(10.0, 4.0 * 2.0 * even_idx / d_model)
    div_term_odd = jnp.power(10.0, 4.0 * 2.0 * odd_idx / d_model)

    pe = jnp.zeros((max_seq_length, 1, d_model), dtype=jnp.float32)
    pe = pe.at[:, 0, 0::2].set(jnp.sin(position / div_term_even))
    pe = pe.at[:, 0, 1::2].set(jnp.cos(position / div_term_odd))
    return pe


def _pe_add_kernel(src_ref, pe_ref, out_ref, *, batch: int):
    # src_ref / out_ref: (TS, B*D) lane-dense;  pe_ref: (TS, D) un-broadcast.
    pe = pe_ref[...]
    if batch > 1:
        # Replicate pe across the B lane groups; matches reshape(S, B*D) layout.
        pe = jnp.concatenate([pe] * batch, axis=-1)
    out_ref[...] = src_ref[...] + pe


def _tile_rows(seq_len: int, row_bytes: int, itemsize: int) -> int:
    """Pick a sequence-tile so the src block is ~4 MiB and sublane-aligned."""
    target_block_bytes = 4 * 1024 * 1024           # good on v5e/v6e/v7x with raised vmem limit
    pack = max(8, 32 // max(itemsize, 1))          # 8 for f32, 16 for bf16, 32 for int8
    ts = max(1, target_block_bytes // max(row_bytes, 1))
    ts = max(pack, (ts // pack) * pack)
    return seq_len if ts >= seq_len else ts


@jax.jit
def positional_encoding_forward(src: jnp.ndarray, pe: jnp.ndarray) -> jnp.ndarray:
    """src: (S, B, D); pe: (max_seq_length, 1, D). Returns src + pe[:S]."""
    S, B, D = src.shape
    # Lane-dense layout: fold (B, D) into the lane axis (free, row-major reshape).
    src2d = src.reshape(S, B * D)
    pe2d = pe[:S, 0, :].astype(src.dtype)          # (S, D) — never materialize (S, B, D)

    itemsize = jnp.dtype(src.dtype).itemsize
    ts = _tile_rows(S, B * D * itemsize, itemsize)
    grid = (pl.cdiv(S, ts),)

    out2d = pl.pallas_call(
        functools.partial(_pe_add_kernel, batch=B),
        out_shape=jax.ShapeDtypeStruct((S, B * D), src.dtype),
        grid=grid,
        in_specs=[
            pl.BlockSpec((ts, B * D), lambda i: (i, 0)),   # streamed src tiles
            pl.BlockSpec((ts, D), lambda i: (i, 0)),       # tiny pe tiles
        ],
        out_specs=pl.BlockSpec((ts, B * D), lambda i: (i, 0)),
        input_output_aliases={0: 0},                       # in-place on src's buffer
        compiler_params=pltpu.CompilerParams(
            dimension_semantics=("parallel",),             # independent tiles (v7x 2-TC)
            vmem_limit_bytes=48 * 1024 * 1024,             # > v5e's 16 MiB default, < v7x physical
        ),
    )(src2d, pe2d)
    return out2d.reshape(S, B, D)


if __name__ == "__main__":
    d_model = 128
    max_seq_length = 30
    seq = 8
    batch = 2

    key = jax.random.PRNGKey(0)
    src = jax.random.normal(key, (seq, batch, d_model), dtype=jnp.float32)
    pe = build_pe_table(d_model, max_seq_length)

    # Reference (computed before the kernel call).
    ref = src + pe[:seq]

    out = positional_encoding_forward(src, pe)
    out = jax.block_until_ready(out)

    assert out.shape == (seq, batch, d_model)
    assert jnp.allclose(out, ref, atol=1e-6), "mismatch vs reference"
    print("KERNEL_OK")
</pallas_src>

<mosaic_0001>
module attributes {stable_mosaic.version = 11 : i64} {
  func.func @_pe_add_kernel(%arg0: i32, %arg1: memref<8x256xf32, #tpu.memory_space<vmem>>, %arg2: memref<8x128xf32, #tpu.memory_space<vmem>>, %arg3: memref<8x256xf32, #tpu.memory_space<vmem>>) attributes {dimension_semantics = [#tpu.dimension_semantics<parallel>], iteration_bounds = array<i64: 1>, scalar_prefetch = 0 : i64, scratch_operands = 0 : i64, tpu.core_type = #tpu.core_type<tc>, window_params = [{transform_indices = @transform_0, window_bounds = array<i64: 8, 256>}, {transform_indices = @transform_1, window_bounds = array<i64: 8, 128>}, {transform_indices = @transform_2, window_bounds = array<i64: 8, 256>}]} {
    %c0 = arith.constant 0 : index
    %c0_0 = arith.constant 0 : index
    %0 = vector.load %arg2[%c0, %c0_0] : memref<8x128xf32, #tpu.memory_space<vmem>>, vector<8x128xf32>
    %1 = tpu.concatenate %0, %0 in 1 : vector<8x128xf32>, vector<8x128xf32> -> vector<8x256xf32>
    %c0_1 = arith.constant 0 : index
    %c0_2 = arith.constant 0 : index
    %2 = vector.load %arg1[%c0_1, %c0_2] : memref<8x256xf32, #tpu.memory_space<vmem>>, vector<8x256xf32>
    %3 = arith.addf %2, %1 : vector<8x256xf32>
    %c0_3 = arith.constant 0 : index
    %c0_4 = arith.constant 0 : index
    %4 = vector.load %arg3[%c0_3, %c0_4] : memref<8x256xf32, #tpu.memory_space<vmem>>, vector<8x256xf32>
    tpu.vector_store %arg3[%c0_3, %c0_4], %3 {strides = array<i32>} : memref<8x256xf32, #tpu.memory_space<vmem>>, vector<8x256xf32>,
    return
  }
  func.func @transform_0(%arg0: i32) -> (i32, i32) {
    %c0_i32 = arith.constant 0 : i32
    %c0_i32_0 = arith.constant 0 : i32
    return %arg0, %c0_i32 : i32, i32
  }
  func.func @transform_1(%arg0: i32) -> (i32, i32) {
    %c0_i32 = arith.constant 0 : i32
    %c0_i32_0 = arith.constant 0 : i32
    return %arg0, %c0_i32 : i32, i32
  }
  func.func @transform_2(%arg0: i32) -> (i32, i32) {
    %c0_i32 = arith.constant 0 : i32
    %c0_i32_0 = arith.constant 0 : i32
    return %arg0, %c0_i32 : i32, i32
  }
}

</mosaic_0001>

<bundles_post_ra>
// kernel: positional_encoding_forward.1
= control target key start
LH: loop header
LB: loop body
LE: loop exit
PB: predicated region body
PF: predicated region fallthrough
CT: control target
= control target key end

     0   :  { %s52_s0 = inlined_call_operand.vmem [shape: f32[8,256], index: 0, kind: input, shape index: {}, may-alias: {0,2}]   ;;  %s53_s1 = inlined_call_operand.vmem [shape: f32[8,128], index: 1, kind: input, shape index: {}]   ;;  %s54_s2 = inlined_call_operand.vmem [shape: f32[8,256], index: 2, kind: output, shape index: {}, may-alias: {0,2}]  }
   0x1   :  { %v11_v0 = vld [vmem:[%s53_s1] sm:$0xff]  ;;  %v13_v2 = vld [vmem:[%s52_s0 + $0x8] sm:$0xff] }
   0x2   :  { %v12_v1 = vld [vmem:[%s52_s0] sm:$0xff]  ;;  %v15_v4 = vadd.f32 %v13_v2, %v11_v0 }
   0x3   :  { %v14_v3 = vadd.f32 %v12_v1, %v11_v0 }
   0x4   :  { %17 = vst [vmem:[%s54_s2 + $0x8] sm:$0xff] %v15_v4 }
   0x5   :  { %16 = vst [vmem:[%s54_s2] sm:$0xff] %v14_v3 }

</bundles_post_ra>
